<compile_context>
chip_gen: v6e
topology: v6e:2x2x1
jax: 0.10.0
libtpu: 0.0.40
codegen_flags: <defaults>
</compile_context>

<pallas_src>
import functools
import math

import jax
import jax.numpy as jnp
from jax import lax
from jax.experimental import pallas as pl
from jax.experimental.pallas import tpu as pltpu

# Constants from the original codebase (hmm.py conventions).
STOP_IX = 0
CONTINUE_IX = 1
SOLVED_IX = 1
UNSOLVED_IX = 0

NEG_INF = float("-inf")


# ----------------------------------------------------------------------------
# Small helpers.
# ----------------------------------------------------------------------------
def _round_up(x, m):
    return ((x + m - 1) // m) * m


def _padded_elems(shape):
    """Element count after (8, 128) sublane/lane padding of the last two dims."""
    if len(shape) == 1:
        return _round_up(shape[0], 128)
    lead = math.prod(shape[:-2]) if len(shape) > 2 else 1
    return lead * _round_up(shape[-2], 8) * _round_up(shape[-1], 128)


def _vmem_limit_bytes(block_shapes, scratch_shapes):
    """Scoped-VMEM limit sized to the actual resident footprint (+margin)."""
    elems = sum(_padded_elems(s) for s in block_shapes) * 2   # double-buffered
    elems += sum(_padded_elems(s) for s in scratch_shapes)
    need = 4 * elems * 2 + (2 << 20)                          # 2x margin + 2MiB
    return int(min(128 << 20, max(8 << 20, need)))


def _lse_keep(x):
    """-inf-safe logsumexp over all but the leading axis (keepdims)."""
    m = jnp.max(x, axis=(1, 2), keepdims=True)
    m0 = jnp.where(m == NEG_INF, 0.0, m)
    return m0 + jnp.log(jnp.sum(jnp.exp(x - m0), axis=(1, 2), keepdims=True))


def _logaddexp(a, b):
    m = jnp.maximum(a, b)
    m0 = jnp.where(m == NEG_INF, 0.0, m)
    return m0 + jnp.log(jnp.exp(a - m0) + jnp.exp(b - m0))


# ----------------------------------------------------------------------------
# Pallas kernel 1: dense "control_net" projection (MXU matmul, lane-padded).
# ----------------------------------------------------------------------------
def _matmul_kernel(x_ref, w_ref, o_ref):
    o_ref[...] = jnp.dot(x_ref[...], w_ref[...],
                         preferred_element_type=jnp.float32)


def pallas_matmul(x, w):
    """x @ w with the output dim padded to a 128-lane multiple, rows gridded."""
    M, D = x.shape
    Din, H = w.shape
    assert Din == D
    Hpad = _round_up(H, 128)
    TM = min(256, _round_up(max(M, 8), 8))
    Mpad = _round_up(max(M, TM), TM)

    xp = jnp.zeros((Mpad, D), jnp.float32).at[:M, :].set(x.astype(jnp.float32))
    wp = jnp.zeros((D, Hpad), jnp.float32).at[:, :H].set(w.astype(jnp.float32))

    out = pl.pallas_call(
        _matmul_kernel,
        out_shape=jax.ShapeDtypeStruct((Mpad, Hpad), jnp.float32),
        grid_spec=pltpu.PrefetchScalarGridSpec(
            num_scalar_prefetch=0,
            grid=(Mpad // TM,),
            in_specs=[pl.BlockSpec((TM, D), lambda i: (i, 0)),
                      pl.BlockSpec((D, Hpad), lambda i: (0, 0))],
            out_specs=pl.BlockSpec((TM, Hpad), lambda i: (i, 0))),
        compiler_params=pltpu.CompilerParams(
            dimension_semantics=("parallel",),
            vmem_limit_bytes=_vmem_limit_bytes(
                [(TM, D), (D, Hpad), (TM, Hpad)], [])),
        cost_estimate=pl.CostEstimate(
            flops=2 * Mpad * D * Hpad,
            transcendentals=0,
            bytes_accessed=4 * (Mpad * D + D * Hpad + Mpad * Hpad)),
    )(xp, wp)
    return out[:M, :H]


# ----------------------------------------------------------------------------
# Pallas kernel 2: cc_fw + cc_bw + cc marginal loss + solved CE loss, fused,
# gridded over the batch (per-block partial loss output).
# ----------------------------------------------------------------------------
def _cc_loss_kernel(BB, b, max_T, cc_weight, abstract_pen,
                    a_ref, sc_ref, ss_ref, st_ref, emb_ref, solved_ref,
                    mask_ref, oh_ref, out_ref, f0_ref, f1h_ref):
    # a_ref:      [BB, max_T,   b]  action logps gathered at the taken action
    # sc_ref:     [BB, max_T+1, b]  stop_logps[..., CONTINUE_IX]
    # ss_ref:     [BB, max_T+1, b]  stop_logps[..., STOP_IX]
    # st_ref:     [BB, max_T+1, b]  start logps (abstract_pen applied in-kernel)
    # emb_ref:    [BB, max_T+1, b]  abstraction embeddings (causal pens on the fly)
    # solved_ref: [BB, max_T+1, 2]  solved logits
    # mask_ref:   [BB, max_T, 1]    float masks (1 valid, 0 pad)
    # oh_ref:     [BB, max_T+1, 1]  one-hot of `lengths` along time
    # out_ref:    [1, 128]          per-block partial loss (lane-broadcast)
    # f0_ref:     VMEM [BB, max_T, b]            forward DP, channel 0 (continue)
    # f1h_ref:    VMEM [max_T+1, BB, max_T, b]   forward DP history, channel 1

    # ------------------------- forward DP (cc_fw) -------------------------
    f0_ref[...] = jnp.full((BB, max_T, b), NEG_INF, jnp.float32)

    def fwd_body(t, carry):
        lse_prev, tlp_acc = carry                              # [BB,1,1] each
        a_t = a_ref[:, pl.ds(t - 1, 1), :]                     # [BB,1,b]
        sc_t = sc_ref[:, pl.ds(t, 1), :]
        ss_t = ss_ref[:, pl.ds(t, 1), :]
        st_t = st_ref[:, pl.ds(t - 1, 1), :] - abstract_pen

        f0_prev = f0_ref[...]                                  # [BB,max_T,b]

        # "old" columns j < t-1 (cols >= t-1 of f0_prev are -inf, stay -inf).
        f0_full = f0_prev + a_t + sc_t
        f1_full = f0_prev + a_t + ss_t
        # "new" column j = t-1.
        new0 = lse_prev + st_t + a_t + sc_t                    # [BB,1,b]
        new1 = lse_prev + st_t + a_t + ss_t

        f0_ref[...] = f0_full
        f0_ref[:, pl.ds(t - 1, 1), :] = new0
        f1h_ref[t] = f1_full
        f1h_ref[t, :, pl.ds(t - 1, 1), :] = new1

        # logsumexp over (j, b) of f[t][..., 1]; column t-1 of f1_full is -inf,
        # so including it alongside new1 is exact.
        lse_t = _logaddexp(_lse_keep(f1_full), _lse_keep(new1))  # [BB,1,1]

        oh_t = oh_ref[:, pl.ds(t, 1), :]                       # [BB,1,1]
        return lse_t, tlp_acc + oh_t * lse_t

    lse0 = jnp.zeros((BB, 1, 1), jnp.float32)   # logsumexp(f[0][..., 1]) == 0
    tlp0 = jnp.zeros((BB, 1, 1), jnp.float32)   # t == 0 contributes OH * 0
    _, tlp = lax.fori_loop(1, max_T + 1, fwd_body, (lse0, tlp0))

    # --------- backward DP (cc_bw) fused with the cc marginal loss ---------
    emb_j = emb_ref[:, 0:max_T, :]                             # hoisted load

    def bwd_body(s, carry):
        g0, g1, cc_acc = carry            # g0,g1: [BB,1,b] = backward f at t+1
        t = max_T - 1 - s
        tau = t + 1

        # marginal(tau) = fw[tau][...,1] + bw[tau][...,1]; causal pen from emb.
        f1_tau = f1h_ref[tau]                                  # [BB,max_T,b]
        emb_tau = emb_ref[:, pl.ds(tau, 1), :]                 # [BB,1,b]
        cp_tau = (emb_j - emb_tau) ** 2                        # [BB,max_T,b]
        normed = jnp.exp(f1_tau + g1 - tlp)                    # padded -> 0
        m_t = mask_ref[:, pl.ds(t, 1), :]                      # masks[:, tau-1]
        cc_c = jnp.sum(normed * cp_tau, axis=(1, 2), keepdims=True)
        cc_acc = cc_acc + cc_c * m_t

        # backward recursion for time t.
        sc_n = sc_ref[:, pl.ds(tau, 1), :]
        ss_n = ss_ref[:, pl.ds(tau, 1), :]
        a_t = a_ref[:, pl.ds(t, 1), :]
        st_t = st_ref[:, pl.ds(t, 1), :] - abstract_pen
        lse_e = _logaddexp(sc_n + g0, ss_n + g1)               # [BB,1,b]
        new_g0 = a_t + lse_e
        new_g1 = jnp.broadcast_to(_lse_keep(st_t + a_t + lse_e), (BB, 1, b))
        valid = m_t > 0.5
        g0 = jnp.where(valid, new_g0, NEG_INF)
        g1 = jnp.where(valid, new_g1, 0.0)
        return g0, g1, cc_acc

    g0_init = jnp.full((BB, 1, b), NEG_INF, jnp.float32)
    g1_init = jnp.zeros((BB, 1, b), jnp.float32)
    cc0 = jnp.zeros((BB, 1, 1), jnp.float32)
    _, _, cc_acc = lax.fori_loop(0, max_T, bwd_body, (g0_init, g1_init, cc0))
    # TODO(synk): the fw/bw consistency diagnostic in cc_loss (hmm_fw fallback
    # + prints) only prints and never changes the returned loss; omitted.

    # ------------------------ solved loss (CE) ------------------------
    solv = solved_ref[...]                                     # [BB, T1, 2]
    l_uns = solv[:, :, UNSOLVED_IX:UNSOLVED_IX + 1]            # [BB, T1, 1]
    l_sol = solv[:, :, SOLVED_IX:SOLVED_IX + 1]
    ls = _logaddexp(l_uns, l_sol)
    loss_unsolved = ls - l_uns
    loss_solved = ls - l_sol
    ohk = oh_ref[...]                                          # [BB, T1, 1]
    maskk = mask_ref[...]                                      # [BB, max_T, 1]
    loss_ce = jnp.where(ohk > 0.5, loss_solved, loss_unsolved)
    solved_loss = (jnp.sum(loss_ce[:, 0:max_T, :] * maskk)
                   + jnp.sum(ohk * loss_ce))

    loss = -jnp.sum(tlp) + cc_weight * jnp.sum(cc_acc) + solved_loss
    out_ref[...] = jnp.zeros((1, 128), jnp.float32) + loss


def cc_loss_pallas(a_sel, stop_c, stop_s, start_logps, emb, solved,
                   maskf, onehot, *, b, cc_weight, abstract_pen,
                   batch_block=1):
    B, max_T, _ = a_sel.shape
    T1 = max_T + 1
    BB = int(batch_block)
    assert B % BB == 0, "batch_block must divide the batch size"
    G = B // BB

    kernel = functools.partial(_cc_loss_kernel, BB, b, max_T,
                               float(cc_weight), float(abstract_pen))

    def bmap(i):
        return (i, 0, 0)

    in_blocks = [(BB, max_T, b), (BB, T1, b), (BB, T1, b), (BB, T1, b),
                 (BB, T1, b), (BB, T1, 2), (BB, max_T, 1), (BB, T1, 1)]
    in_specs = [pl.BlockSpec(s, bmap) for s in in_blocks]
    scratch_shapes = [(BB, max_T, b), (T1, BB, max_T, b)]

    args = (a_sel.astype(jnp.float32), stop_c.astype(jnp.float32),
            stop_s.astype(jnp.float32), start_logps.astype(jnp.float32),
            emb.astype(jnp.float32), solved.astype(jnp.float32),
            maskf.astype(jnp.float32)[..., None],
            onehot.astype(jnp.float32)[..., None])
    bytes_acc = int(sum(int(x.size) for x in args) * 4 + G * 128 * 4)

    out = pl.pallas_call(
        kernel,
        out_shape=jax.ShapeDtypeStruct((G, 128), jnp.float32),
        grid_spec=pltpu.PrefetchScalarGridSpec(
            num_scalar_prefetch=0,
            grid=(G,),
            in_specs=in_specs,
            out_specs=pl.BlockSpec((1, 128), lambda i: (i, 0)),
            scratch_shapes=[pltpu.VMEM(s, jnp.float32)
                            for s in scratch_shapes]),
        compiler_params=pltpu.CompilerParams(
            dimension_semantics=("parallel",),
            vmem_limit_bytes=_vmem_limit_bytes(in_blocks + [(1, 128)],
                                               scratch_shapes)),
        cost_estimate=pl.CostEstimate(
            flops=int(30 * B * max_T * max_T * b),
            transcendentals=int(4 * B * max_T * max_T * b),
            bytes_accessed=bytes_acc),
    )(*args)
    return jnp.sum(out[:, 0])


# ----------------------------------------------------------------------------
# CausalNet forward (batched path), with a synthetic deterministic control_net.
# ----------------------------------------------------------------------------
def init_control_net_params(key, state_dim, b, n_actions):
    h_total = b * n_actions + 2 * b + b + 2 + b
    w = 0.3 * jax.random.normal(key, (state_dim, h_total), dtype=jnp.float32)
    return {"W": w}


def control_net_forward(params, s_i_batch, b, n_actions):
    """Synthetic control_net: one dense layer (Pallas matmul) + head splits.

    Head splits / log_softmax stay in XLA (tiny tensors); causal_pens are NOT
    materialized here -- the cc-loss kernel builds them on the fly from `emb`.
    """
    B, T1, D = s_i_batch.shape
    s_flat = s_i_batch.reshape(B * T1, D)
    out = pallas_matmul(s_flat, params["W"])                   # [B*T1, H]

    i0 = b * n_actions
    i1 = i0 + 2 * b
    i2 = i1 + b
    i3 = i2 + 2
    action_logits = out[:, :i0].reshape(B, T1, b, n_actions)
    stop_logits = out[:, i0:i1].reshape(B, T1, b, 2)
    start_logits = out[:, i1:i2].reshape(B, T1, b)
    solved = out[:, i2:i3].reshape(B, T1, 2)
    emb = out[:, i3:].reshape(B, T1, b)

    action_logps = jax.nn.log_softmax(action_logits, axis=-1)
    stop_logps = jax.nn.log_softmax(stop_logits, axis=-1)
    start_logps = jax.nn.log_softmax(start_logits, axis=-1)
    # causal_pens[i, start, stop, k] == (emb[i,start,k]-emb[i,stop,k])**2 is
    # computed inside the cc-loss kernel (never materialized).
    return action_logps, stop_logps, start_logps, emb, solved, None


def causal_net_forward(params, s_i_batch, actions_batch, lengths, masks,
                       *, b, n_actions, cc_weight=1.0, abstract_pen=0.0,
                       batch_block=1):
    """CausalNet.forward with batched=True (the default path)."""
    (action_logps, stop_logps, start_logps,
     emb, solved, _) = control_net_forward(params, s_i_batch, b, n_actions)
    B = lengths.shape[0]
    max_T = action_logps.shape[1] - 1

    # action_logps[i, t, k, actions[i, t]] for t < max_T  -> [B, max_T, b]
    act_idx = actions_batch[:, :, None, None]
    a_sel = jnp.take_along_axis(action_logps[:, :max_T], act_idx,
                                axis=3)[..., 0]

    # stop channel split (STOP_IX == 0 flip handled by the channel pick).
    stop_c = stop_logps[..., CONTINUE_IX]
    stop_s = stop_logps[..., STOP_IX]

    maskf = masks.astype(jnp.float32)
    onehot = (jnp.arange(max_T + 1)[None, :]
              == lengths[:, None]).astype(jnp.float32)

    return cc_loss_pallas(a_sel, stop_c, stop_s, start_logps, emb, solved,
                          maskf, onehot, b=b, cc_weight=cc_weight,
                          abstract_pen=abstract_pen, batch_block=batch_block)


# ----------------------------------------------------------------------------
if __name__ == "__main__":
    B, max_T, b, n_actions, D = 2, 8, 4, 5, 16
    T1 = max_T + 1

    key = jax.random.PRNGKey(0)
    k_state, k_act, k_w = jax.random.split(key, 3)

    s_i_batch = jax.random.normal(k_state, (B, T1, D), dtype=jnp.float32)
    actions_batch = jax.random.randint(k_act, (B, max_T), 0, n_actions)
    lengths = jnp.array([5, 8], dtype=jnp.int32)
    masks = (jnp.arange(max_T)[None, :] < lengths[:, None]).astype(jnp.int32)

    params = init_control_net_params(k_w, D, b, n_actions)

    loss = causal_net_forward(params, s_i_batch, actions_batch, lengths, masks,
                              b=b, n_actions=n_actions,
                              cc_weight=1.0, abstract_pen=0.0,
                              batch_block=1)
    loss = jax.block_until_ready(loss)
    assert bool(jnp.isfinite(loss)), f"non-finite loss: {loss}"
    print("KERNEL_OK")
</pallas_src>

<mosaic_0001>
module attributes {stable_mosaic.version = 11 : i64} {
  func.func @_matmul_kernel(%arg0: i32, %arg1: memref<24x16xf32, #tpu.memory_space<vmem>>, %arg2: memref<16x128xf32, #tpu.memory_space<vmem>>, %arg3: memref<24x128xf32, #tpu.memory_space<vmem>>) attributes {dimension_semantics = [#tpu.dimension_semantics<parallel>], iteration_bounds = array<i64: 1>, scalar_prefetch = 0 : i64, scratch_operands = 0 : i64, tpu.core_type = #tpu.core_type<tc>, window_params = [{transform_indices = @transform_0, window_bounds = array<i64: 24, 16>}, {pipeline_mode = #tpu.pipeline_mode<synchronous>, transform_indices = @transform_1, window_bounds = array<i64: 16, 128>}, {transform_indices = @transform_2, window_bounds = array<i64: 24, 128>}]} {
    %c0 = arith.constant 0 : index
    %c0_0 = arith.constant 0 : index
    %0 = vector.load %arg1[%c0, %c0_0] : memref<24x16xf32, #tpu.memory_space<vmem>>, vector<24x16xf32>
    %c0_1 = arith.constant 0 : index
    %c0_2 = arith.constant 0 : index
    %1 = vector.load %arg2[%c0_1, %c0_2] : memref<16x128xf32, #tpu.memory_space<vmem>>, vector<16x128xf32>
    %cst = arith.constant dense<0.000000e+00> : vector<24x128xf32>
    %2 = tpu.matmul %0, %1, %cst {dimension_numbers = #tpu.dot_dimension_numbers<[1], [0], [0], [1], [0, 0, 1, 1], [], []>} : vector<24x16xf32>, vector<16x128xf32>, vector<24x128xf32> -> vector<24x128xf32>
    %c0_3 = arith.constant 0 : index
    %c0_4 = arith.constant 0 : index
    %3 = vector.load %arg3[%c0_3, %c0_4] : memref<24x128xf32, #tpu.memory_space<vmem>>, vector<24x128xf32>
    tpu.vector_store %arg3[%c0_3, %c0_4], %2 {strides = array<i32>} : memref<24x128xf32, #tpu.memory_space<vmem>>, vector<24x128xf32>,
    return
  }
  func.func @transform_0(%arg0: i32) -> (i32, i32) {
    %c0_i32 = arith.constant 0 : i32
    %c0_i32_0 = arith.constant 0 : i32
    return %arg0, %c0_i32 : i32, i32
  }
  func.func @transform_1(%arg0: i32) -> (i32, i32) {
    %c0_i32 = arith.constant 0 : i32
    %c0_i32_0 = arith.constant 0 : i32
    %c0_i32_1 = arith.constant 0 : i32
    return %c0_i32, %c0_i32_0 : i32, i32
  }
  func.func @transform_2(%arg0: i32) -> (i32, i32) {
    %c0_i32 = arith.constant 0 : i32
    %c0_i32_0 = arith.constant 0 : i32
    return %arg0, %c0_i32 : i32, i32
  }
}

</mosaic_0001>

<bundles_post_ra>
// kernel: tpu_custom_call.1
= control target key start
LH: loop header
LB: loop body
LE: loop exit
PB: predicated region body
PF: predicated region fallthrough
CT: control target
= control target key end

     0   :  { %v178_v1 = vmov 0.0   ;;  %s216_s0 = inlined_call_operand.vmem [shape: f32[24,16], index: 0, kind: input, shape index: {}]   ;;  %s217_s1 = inlined_call_operand.vmem [shape: f32[16,128], index: 1, kind: input, shape index: {}]   ;;  %s218_s2 = inlined_call_operand.hbm [shape: f32[24,128], index: 2, kind: output, shape index: {}]  }
   0x1   :  { %v16_v0 = vld [vmem:[%s217_s1 + $0x8] sm:$0xff]  ;;  %147 = vmatprep.subr.mxu1 %v178_v1  ;;  %134 = vmatprep.subr.mxu0 %v178_v1  ;;  %v15_v2 = vld [vmem:[%s217_s1] sm:$0xff] }
   0x2   :  { %7 = vsyncpa [#allocation3], 0  ;;  %149 = vmatpush3.msra.mxu1 %v16_v0  ;;  %135 = vmatpush3.msra.mxu0 %v16_v0  ;;  %v13_v3 = vld [vmem:[%s216_s0 + $0x8] sm:$0xff]  ;;  %vm17_vm0 = vcmask 130048   ;;  %vm179_vm1 = vmmov 0   ;;  %v12_v4 = vld [vmem:[%s216_s0] sm:$0xff] }
   0x3   :  { %148 = vmatprep.subr.mxu1 %v178_v1  ;;  %141 = vmatprep.mubr.msk.f32.mxu1 %vm179_vm1, %v178_v1  ;;  %v14_v5 = vld [vmem:[%s216_s0 + $0x10] sm:$0xff]  ;;  %s180_s18 = smov [#allocation2]  }
   0x4   :  { %150 = vmatpush3.msra.mxu1 %v15_v2  ;;  %136 = vmatprep.subr.mxu0 %v178_v1  ;;  %s115_s19 = sshll.u32 %s180_s18, 4  ;;  %s116_s19 = int_to_ptr.vmem [resolvable:$true] %s115_s19 }
   0x5   :  { %142 = vmatmul.mubr.msk.f32.vlgmr.msra.gmra.mxu1 %vm17_vm0, %v13_v3  ;;  %137 = vmatpush3.msra.mxu0 %v15_v2  ;;  %s156_s20 = scalar_lea.vmem %s116_s19, 384  ;;  %p161_p1 = scmp.lt.s32.totalorder %s116_s19, %s116_s19 }
   0x6   :  { %138 = vmatprep.mubr.msk.f32.mxu0 %vm179_vm1, %v178_v1  ;;  %144 = vmatprep.mubr.msk.f32.mxu1 %vm179_vm1, %v178_v1  ;;  %p157_p0 = scmp.ne.s32.totalorder %s116_s19, %s156_s20  ;;  %p162_p2 = scmp.lt.s32.totalorder %s156_s20, %s156_s20 }
   0x7   :  { %139 = vmatmul.mubr.msk.f32.vlgmr.msra.gmra.mxu0 %vm17_vm0, %v12_v4 }
   0x8   :  { %p163_p3 = por %p162_p2, %p161_p1 }
   0x9   :  { %145 = vmatmul.mubr.msk.f32.gmra.mxu1 %vm17_vm0, %v14_v5 }
   0xa   :  { %p164_p4 = pnand %p163_p3, %p157_p0 }
  0xc5   :  { %v98_v6 = vpop.f32.mrf.mxu1 }
  0xc6   :  { %108 = vst [vmem:[#allocation2 + $0x8] sm:$0xff] %v98_v6 }
  0xc7   :  { %v93_v7 = vpop.f32.mrf.mxu0  ;;  %v143_v8 = vpop.f32.mrf.mxu1 }
  0xc8   :  { %107 = vst [vmem:[#allocation2] sm:$0xff] %v93_v7 }
  0xc9   :  { %v140_v9 = vpop.f32.mrf.mxu0  ;;  %v103_v10 = vpop.f32.mrf.mxu1 }
  0xca   :  { %109 = vst [vmem:[#allocation2 + $0x10] sm:$0xff] %v103_v10 }
  0xcb   :  { %v146_v11 = vpop.f32.mrf.mxu1 }
  0xcc   :  { %167 = shalt.err (!%p164_p4)
}
  0xcd   :  { %s181_s0 = smov 128   ;;  %s182_s21 = smov 8  }
  0xce   :  { %121 = dma.vmem_to_hbm [thread:$0]  %s116_s19, 384, %s218_s2, [#allocation3], %s181_s0, %s181_s0, %s182_s21  }
  0xcf   :  { %176 = dma.done.wait [#allocation3], 384  }
  0xd0   :  { %177 = vsyncadd [#allocation3], 4294966912 }
  0xd1   :  { %125 = vsyncpa [#allocation3], 1 }

</bundles_post_ra>
